<compile_context>
chip_gen: v5e
topology: v5e:2x2
jax: 0.10.0
libtpu: 0.0.40
codegen_flags: <defaults>
</compile_context>

<pallas_src>
import math
from functools import partial

import numpy as np
import jax
import jax.numpy as jnp
from jax.experimental import pallas as pl
from jax.experimental.pallas import tpu as pltpu


# ----------------------------- config (synthetic) -----------------------------
CFG = dict(fs=22050, overlap=0.5, arch="m2l", n_frames=8,
           win_len=128, hop_len=64, n_fft=128, n_mels=32)
NEW_FS = 44100
LOWPASS_FILTER_WIDTH = 6      # torchaudio Resample defaults (sinc_interp_hann)
ROLLOFF = 0.99

LATENT_DIM = 32               # stand-in encdec latent channels
ENC_WIN = 128                 # stand-in encdec analysis window (44.1 kHz samples)
ENC_HOP = 64                  # stand-in encdec hop (44.1 kHz samples)


# ------------------- torchaudio-faithful sinc resample kernel -----------------
def _sinc_resample_kernel(orig_freq: int, new_freq: int):
    """Replicates torchaudio.functional._get_sinc_resample_kernel (sinc_interp_hann)."""
    gcd = math.gcd(int(orig_freq), int(new_freq))
    orig, new = orig_freq // gcd, new_freq // gcd
    base_freq = min(orig, new) * ROLLOFF
    width = int(math.ceil(LOWPASS_FILTER_WIDTH * orig / base_freq))
    idx = np.arange(-width, width + orig, dtype=np.float64) / orig
    t = np.arange(0, -new, -1, dtype=np.float64)[:, None] / new + idx[None, :]
    t = np.clip(t * base_freq, -LOWPASS_FILTER_WIDTH, LOWPASS_FILTER_WIDTH)
    window = np.cos(t * np.pi / LOWPASS_FILTER_WIDTH / 2) ** 2
    t = t * np.pi
    kern = np.where(t == 0, 1.0, np.sin(t) / np.where(t == 0, 1.0, t))
    kern = kern * window * (base_freq / orig)
    return kern, width, orig, new          # kern: (new, W) float64


def _round_up(x, m):
    return ((x + m - 1) // m) * m


def _build_resample_frame_matrix(kern, new):
    """Fold the polyphase FIR and the win=ENC_WIN / hop=ENC_HOP framing of the
    resampled signal into one (128, ENC_WIN) matrix K:
        yf[row, w] = sum_u xf[row, u] * K[u, w] == y_44k[ENC_HOP*frame + w]."""
    W = kern.shape[1]
    K = np.zeros((128, ENC_WIN), np.float64)
    for w in range(ENC_WIN):
        p, q = w % new, w // new
        K[q:q + W, w] = kern[p]
    return jnp.asarray(K, jnp.float32)


def _build_order_matrix(tile_lat, n_shifts):
    """0/1 matrix turning shift-major frame order (s*R + r) into time order (n_shifts*r + s)."""
    R = tile_lat // n_shifts
    q = np.arange(tile_lat)
    t = n_shifts * (q % R) + q // R
    P = np.zeros((tile_lat, tile_lat), np.float32)
    P[q, t] = 1.0
    return jnp.asarray(P)


# --------------------------------- kernel --------------------------------------
def _fused_resample_encdec_kernel(x_ref, halo_ref, kmat_ref, wenc_ref, wdec_ref,
                                  perm_ref, out_ref):
    # x_ref:    (1, R, 128)   contiguous slab of the padded input waveform
    # halo_ref: (1, 8, 128)   next 8 rows of the same waveform (only row 0 is used)
    # kmat:     (128, 128)    polyphase-FIR + framing folded into one matmul
    # wenc:     (128, D), wdec: (D, D), perm: (4R, 4R) 0/1 lane-reorder matrix
    # out_ref:  (1, D, 4R)    latent block, channel-major, lane-dense along time
    a = x_ref[0]                                        # (R, 128)
    halo = halo_ref[0]                                  # (8, 128)
    r_rows = a.shape[0]
    slab = jnp.concatenate([a, halo[0:1, :]], axis=0)   # (R + 1, 128)

    # Overlapping x-domain frames (hop = ENC_HOP // 2 = 32 input samples) built from
    # shifted lane slices of the slab; 4 shift groups, rows in shift-major order.
    parts = [a]
    for s in (1, 2, 3):
        c = 32 * s
        parts.append(jnp.concatenate(
            [slab[:r_rows, c:], slab[1:r_rows + 1, :c]], axis=1))
    xf = jnp.concatenate(parts, axis=0)                 # (4R, 128)

    # Polyphase sinc resample (22.05k -> 44.1k) + 44.1 kHz framing as one matmul.
    yf = jnp.dot(xf, kmat_ref[...], preferred_element_type=jnp.float32)      # (4R, 128)

    # Stand-in encdec: linear -> tanh -> linear, applied per frame.
    h = jnp.tanh(jnp.dot(yf, wenc_ref[...], preferred_element_type=jnp.float32))
    o = jnp.dot(h, wdec_ref[...], preferred_element_type=jnp.float32)        # (4R, D)

    # Channel-major output; 0/1 matmul reorders lanes shift-major -> time order.
    out_ref[0] = jnp.dot(jnp.transpose(o), perm_ref[...],
                         preferred_element_type=jnp.float32)                 # (D, 4R)


# -------------------------------- wrapper ---------------------------------------
def resample_encode(x, w_enc, w_dec, orig_fs, new_fs):
    """Fused Resample(orig_fs -> new_fs) + framed encdec.  x: (B, T) -> (B, D, n_lat)."""
    B, T = x.shape
    kern, width, orig, new = _sinc_resample_kernel(orig_fs, new_fs)
    if orig != 1:
        raise NotImplementedError("in-kernel framing assumes orig==1 after gcd")
    W = kern.shape[1]
    x_hop = ENC_HOP // new                    # input samples per latent hop  (= 32)
    n_shifts = 128 // x_hop                   # frames starting per 128-lane row (= 4)
    assert x_hop * n_shifts == 128
    assert ENC_WIN // new + W - 1 <= 128      # one frame's taps fit in a 128-wide window
    assert T * new >= ENC_WIN, "waveform too short for one encdec frame"
    n_lat = (T * new - ENC_WIN) // ENC_HOP + 1

    tile_lat = min(512, _round_up(n_lat, 128))  # latent frames per grid step (VMEM-safe on v7x)
    rows = tile_lat // n_shifts                 # 128-sample input rows per grid step
    chunk = tile_lat * x_hop                    # input samples per grid step
    n_tiles = pl.cdiv(n_lat, tile_lat)

    # Zero pad: `width` on the left (sinc group delay); on the right up to an extra
    # full chunk so every tile has an in-bounds halo row.
    total = (n_tiles + 1) * chunk
    x_pad = jnp.pad(x, ((0, 0), (width, total - width - T)))
    x_rows = x_pad.reshape(B, (n_tiles + 1) * rows, 128)

    kmat = _build_resample_frame_matrix(kern, new)
    perm = _build_order_matrix(tile_lat, n_shifts)

    # kmat / w_enc / w_dec / perm have constant index maps -> fetched once and kept
    # resident by the pipeline (they are tiny compared to the data stream).
    return pl.pallas_call(
        _fused_resample_encdec_kernel,
        out_shape=jax.ShapeDtypeStruct((B, LATENT_DIM, n_lat), jnp.float32),
        grid=(B, n_tiles),
        in_specs=[
            pl.BlockSpec((1, rows, 128), lambda b, j: (b, j, 0)),
            pl.BlockSpec((1, 8, 128), lambda b, j: (b, (j + 1) * (rows // 8), 0)),
            pl.BlockSpec((128, ENC_WIN), lambda b, j: (0, 0)),
            pl.BlockSpec((ENC_WIN, LATENT_DIM), lambda b, j: (0, 0)),
            pl.BlockSpec((LATENT_DIM, LATENT_DIM), lambda b, j: (0, 0)),
            pl.BlockSpec((tile_lat, tile_lat), lambda b, j: (0, 0)),
        ],
        out_specs=pl.BlockSpec((1, LATENT_DIM, tile_lat), lambda b, j: (b, 0, j)),
        compiler_params=pltpu.CompilerParams(
            dimension_semantics=("parallel", "parallel"),
            vmem_limit_bytes=32 * 1024 * 1024),
    )(x_rows, x_rows, kmat, w_enc, w_dec, perm)


def forward_m2l_train(x_i, x_j, params):
    """GPUTransformNeuralfpM2L.forward, train=True branch."""
    if CFG["fs"] == NEW_FS:
        # TODO(synk): no-resample branch (fs == 44100) is not exercised by CFG.
        raise NotImplementedError
    b = x_i.shape[0]
    x = jnp.concatenate([x_i, x_j], axis=0)   # one pallas_call feeds both signals / both TCs
    X = resample_encode(x, params["w_enc"], params["w_dec"], CFG["fs"], NEW_FS)
    return X[:b], X[b:]


# --------------------------- pure-JAX reference --------------------------------
def _ref_resample(x, orig_freq, new_freq):
    kern, width, orig, new = _sinc_resample_kernel(orig_freq, new_freq)
    kern = jnp.asarray(kern, jnp.float32)
    B, T = x.shape
    W = kern.shape[1]
    x_pad = jnp.pad(x, ((0, 0), (width, width + orig)))
    n_out = (x_pad.shape[1] - W) // orig + 1
    idx = jnp.arange(n_out)[:, None] * orig + jnp.arange(W)[None, :]
    frames = x_pad[:, idx]
    out = jnp.einsum("bnw,cw->bnc", frames, kern).reshape(B, -1)
    return out[:, : int(math.ceil(new_freq * T / orig_freq))]


def _ref_encdec(x44k, w_enc, w_dec):
    B, T = x44k.shape
    n_lat = (T - ENC_WIN) // ENC_HOP + 1
    idx = jnp.arange(n_lat)[:, None] * ENC_HOP + jnp.arange(ENC_WIN)[None, :]
    frames = x44k[:, idx]
    h = jnp.tanh(jnp.einsum("bnw,wd->bnd", frames, w_enc))
    out = jnp.einsum("bnd,de->bne", h, w_dec)
    return jnp.transpose(out, (0, 2, 1))


def _ref_forward(x_i, x_j, params):
    x_i = _ref_resample(x_i, CFG["fs"], NEW_FS)
    x_j = _ref_resample(x_j, CFG["fs"], NEW_FS)
    return (_ref_encdec(x_i, params["w_enc"], params["w_dec"]),
            _ref_encdec(x_j, params["w_enc"], params["w_dec"]))


# ----------------------------------- main ---------------------------------------
if __name__ == "__main__":
    key = jax.random.PRNGKey(0)
    k1, k2, k3, k4 = jax.random.split(key, 4)

    B, T = 2, 240                                    # small (B, T) waveforms @ 22050 Hz
    x_i = jax.random.normal(k1, (B, T), jnp.float32)
    x_j = jax.random.normal(k2, (B, T), jnp.float32)

    params = dict(
        w_enc=(jax.random.normal(k3, (ENC_WIN, LATENT_DIM), jnp.float32)
               / np.float32(np.sqrt(ENC_WIN))),
        w_dec=(jax.random.normal(k4, (LATENT_DIM, LATENT_DIM), jnp.float32)
               / np.float32(np.sqrt(LATENT_DIM))),
    )

    fwd = jax.jit(partial(forward_m2l_train, params=params))
    X_i, X_j = fwd(x_i, x_j)
    jax.block_until_ready((X_i, X_j))

    # correctness check vs structurally independent pure-JAX reference
    R_i, R_j = _ref_forward(x_i, x_j, params)
    n_lat = (2 * T - ENC_WIN) // ENC_HOP + 1
    assert X_i.shape == (B, LATENT_DIM, n_lat) and X_j.shape == (B, LATENT_DIM, n_lat)
    np.testing.assert_allclose(np.asarray(X_i), np.asarray(R_i), rtol=1e-4, atol=1e-4)
    np.testing.assert_allclose(np.asarray(X_j), np.asarray(R_j), rtol=1e-4, atol=1e-4)

    print("KERNEL_OK")
</pallas_src>

<mosaic_0001>
module attributes {stable_mosaic.version = 11 : i64} {
  func.func @_fused_resample_encdec_kernel(%arg0: i32, %arg1: i32, %arg2: memref<1x32x128xf32, #tpu.memory_space<vmem>>, %arg3: memref<1x8x128xf32, #tpu.memory_space<vmem>>, %arg4: memref<128x128xf32, #tpu.memory_space<vmem>>, %arg5: memref<128x32xf32, #tpu.memory_space<vmem>>, %arg6: memref<32x32xf32, #tpu.memory_space<vmem>>, %arg7: memref<128x128xf32, #tpu.memory_space<vmem>>, %arg8: memref<1x32x128xf32, #tpu.memory_space<vmem>>) attributes {dimension_semantics = [#tpu.dimension_semantics<parallel>, #tpu.dimension_semantics<parallel>], iteration_bounds = array<i64: 4, 1>, scalar_prefetch = 0 : i64, scratch_operands = 0 : i64, tpu.core_type = #tpu.core_type<tc>, window_params = [{transform_indices = @transform_0, window_bounds = array<i64: 1, 32, 128>}, {transform_indices = @transform_1, window_bounds = array<i64: 1, 8, 128>}, {pipeline_mode = #tpu.pipeline_mode<synchronous>, transform_indices = @transform_2, window_bounds = array<i64: 128, 128>}, {pipeline_mode = #tpu.pipeline_mode<synchronous>, transform_indices = @transform_3, window_bounds = array<i64: 128, 32>}, {pipeline_mode = #tpu.pipeline_mode<synchronous>, transform_indices = @transform_4, window_bounds = array<i64: 32, 32>}, {pipeline_mode = #tpu.pipeline_mode<synchronous>, transform_indices = @transform_5, window_bounds = array<i64: 128, 128>}, {transform_indices = @transform_6, window_bounds = array<i64: 1, 32, 128>}]} {
    %c0 = arith.constant 0 : index
    %c0_0 = arith.constant 0 : index
    %c0_1 = arith.constant 0 : index
    %0 = vector.load %arg2[%c0, %c0_0, %c0_1] : memref<1x32x128xf32, #tpu.memory_space<vmem>>, vector<1x32x128xf32>
    %1 = vector.shape_cast %0 : vector<1x32x128xf32> to vector<32x128xf32>
    %c0_2 = arith.constant 0 : index
    %c0_3 = arith.constant 0 : index
    %c0_4 = arith.constant 0 : index
    %2 = vector.load %arg3[%c0_2, %c0_3, %c0_4] : memref<1x8x128xf32, #tpu.memory_space<vmem>>, vector<1x8x128xf32>
    %3 = vector.shape_cast %2 : vector<1x8x128xf32> to vector<8x128xf32>
    %4 = vector.extract_strided_slice %3 {offsets = [0, 0], sizes = [1, 128], strides = [1, 1]} : vector<8x128xf32> to vector<1x128xf32>
    %5 = tpu.concatenate %1, %4 in 0 : vector<32x128xf32>, vector<1x128xf32> -> vector<33x128xf32>
    %6 = vector.extract_strided_slice %5 {offsets = [0, 32], sizes = [32, 96], strides = [1, 1]} : vector<33x128xf32> to vector<32x96xf32>
    %7 = vector.extract_strided_slice %5 {offsets = [1, 0], sizes = [32, 32], strides = [1, 1]} : vector<33x128xf32> to vector<32x32xf32>
    %8 = tpu.concatenate %6, %7 in 1 : vector<32x96xf32>, vector<32x32xf32> -> vector<32x128xf32>
    %9 = vector.extract_strided_slice %5 {offsets = [0, 64], sizes = [32, 64], strides = [1, 1]} : vector<33x128xf32> to vector<32x64xf32>
    %10 = vector.extract_strided_slice %5 {offsets = [1, 0], sizes = [32, 64], strides = [1, 1]} : vector<33x128xf32> to vector<32x64xf32>
    %11 = tpu.concatenate %9, %10 in 1 : vector<32x64xf32>, vector<32x64xf32> -> vector<32x128xf32>
    %12 = vector.extract_strided_slice %5 {offsets = [0, 96], sizes = [32, 32], strides = [1, 1]} : vector<33x128xf32> to vector<32x32xf32>
    %13 = vector.extract_strided_slice %5 {offsets = [1, 0], sizes = [32, 96], strides = [1, 1]} : vector<33x128xf32> to vector<32x96xf32>
    %14 = tpu.concatenate %12, %13 in 1 : vector<32x32xf32>, vector<32x96xf32> -> vector<32x128xf32>
    %15 = tpu.concatenate %1, %8, %11, %14 in 0 : vector<32x128xf32>, vector<32x128xf32>, vector<32x128xf32>, vector<32x128xf32> -> vector<128x128xf32>
    %c0_5 = arith.constant 0 : index
    %c0_6 = arith.constant 0 : index
    %16 = vector.load %arg4[%c0_5, %c0_6] : memref<128x128xf32, #tpu.memory_space<vmem>>, vector<128x128xf32>
    %cst = arith.constant dense<0.000000e+00> : vector<128x128xf32>
    %17 = tpu.matmul %15, %16, %cst {dimension_numbers = #tpu.dot_dimension_numbers<[1], [0], [0], [1], [0, 0, 1, 1], [], []>} : vector<128x128xf32>, vector<128x128xf32>, vector<128x128xf32> -> vector<128x128xf32>
    %c0_7 = arith.constant 0 : index
    %c0_8 = arith.constant 0 : index
    %18 = vector.load %arg5[%c0_7, %c0_8] : memref<128x32xf32, #tpu.memory_space<vmem>>, vector<128x32xf32>
    %cst_9 = arith.constant dense<0.000000e+00> : vector<128x32xf32>
    %19 = tpu.matmul %17, %18, %cst_9 {dimension_numbers = #tpu.dot_dimension_numbers<[1], [0], [0], [1], [0, 0, 1, 1], [], []>} : vector<128x128xf32>, vector<128x32xf32>, vector<128x32xf32> -> vector<128x32xf32>
    %20 = math.tanh %19 : vector<128x32xf32>
    %c0_10 = arith.constant 0 : index
    %c0_11 = arith.constant 0 : index
    %21 = vector.load %arg6[%c0_10, %c0_11] : memref<32x32xf32, #tpu.memory_space<vmem>>, vector<32x32xf32>
    %cst_12 = arith.constant dense<0.000000e+00> : vector<128x32xf32>
    %22 = tpu.matmul %20, %21, %cst_12 {dimension_numbers = #tpu.dot_dimension_numbers<[1], [0], [0], [1], [0, 0, 1, 1], [], []>} : vector<128x32xf32>, vector<32x32xf32>, vector<128x32xf32> -> vector<128x32xf32>
    %23 = tpu.transpose %22, [1, 0] : vector<128x32xf32> -> vector<32x128xf32>
    %c0_13 = arith.constant 0 : index
    %c0_14 = arith.constant 0 : index
    %24 = vector.load %arg7[%c0_13, %c0_14] : memref<128x128xf32, #tpu.memory_space<vmem>>, vector<128x128xf32>
    %cst_15 = arith.constant dense<0.000000e+00> : vector<32x128xf32>
    %25 = tpu.matmul %23, %24, %cst_15 {dimension_numbers = #tpu.dot_dimension_numbers<[1], [0], [0], [1], [0, 0, 1, 1], [], []>} : vector<32x128xf32>, vector<128x128xf32>, vector<32x128xf32> -> vector<32x128xf32>
    %c0_16 = arith.constant 0 : index
    %c0_17 = arith.constant 0 : index
    %c0_18 = arith.constant 0 : index
    %26 = vector.load %arg8[%c0_16, %c0_17, %c0_18] : memref<1x32x128xf32, #tpu.memory_space<vmem>>, vector<1x32x128xf32>
    %27 = vector.shape_cast %26 : vector<1x32x128xf32> to vector<32x128xf32>
    %28 = vector.shape_cast %25 : vector<32x128xf32> to vector<1x32x128xf32>
    tpu.vector_store %arg8[%c0_16, %c0_17, %c0_18], %28 {strides = array<i32>} : memref<1x32x128xf32, #tpu.memory_space<vmem>>, vector<1x32x128xf32>,
    return
  }
  func.func @transform_0(%arg0: i32, %arg1: i32) -> (i32, i32, i32) {
    %c0_i32 = arith.constant 0 : i32
    %c0_i32_0 = arith.constant 0 : i32
    return %arg0, %arg1, %c0_i32 : i32, i32, i32
  }
  func.func @transform_1(%arg0: i32, %arg1: i32) -> (i32, i32, i32) {
    %c1_i32 = arith.constant 1 : i32
    %0 = arith.addi %arg1, %c1_i32 : i32
    %c4_i32 = arith.constant 4 : i32
    %1 = arith.muli %0, %c4_i32 : i32
    %c0_i32 = arith.constant 0 : i32
    %c0_i32_0 = arith.constant 0 : i32
    return %arg0, %1, %c0_i32 : i32, i32, i32
  }
  func.func @transform_2(%arg0: i32, %arg1: i32) -> (i32, i32) {
    %c0_i32 = arith.constant 0 : i32
    %c0_i32_0 = arith.constant 0 : i32
    %c0_i32_1 = arith.constant 0 : i32
    return %c0_i32, %c0_i32_0 : i32, i32
  }
  func.func @transform_3(%arg0: i32, %arg1: i32) -> (i32, i32) {
    %c0_i32 = arith.constant 0 : i32
    %c0_i32_0 = arith.constant 0 : i32
    %c0_i32_1 = arith.constant 0 : i32
    return %c0_i32, %c0_i32_0 : i32, i32
  }
  func.func @transform_4(%arg0: i32, %arg1: i32) -> (i32, i32) {
    %c0_i32 = arith.constant 0 : i32
    %c0_i32_0 = arith.constant 0 : i32
    %c0_i32_1 = arith.constant 0 : i32
    return %c0_i32, %c0_i32_0 : i32, i32
  }
  func.func @transform_5(%arg0: i32, %arg1: i32) -> (i32, i32) {
    %c0_i32 = arith.constant 0 : i32
    %c0_i32_0 = arith.constant 0 : i32
    %c0_i32_1 = arith.constant 0 : i32
    return %c0_i32, %c0_i32_0 : i32, i32
  }
  func.func @transform_6(%arg0: i32, %arg1: i32) -> (i32, i32, i32) {
    %c0_i32 = arith.constant 0 : i32
    %c0_i32_0 = arith.constant 0 : i32
    return %arg0, %c0_i32, %arg1 : i32, i32, i32
  }
}

</mosaic_0001>

<bundles_post_ra>
// kernel: forward_m2l_train.1
= control target key start
LH: loop header
LB: loop body
LE: loop exit
PB: predicated region body
PF: predicated region fallthrough
CT: control target
= control target key end

     0   :  { %s1135_s21 = smov 0   ;;  %s1137_s22 = smov 0   ;;  %s1363_s0 = inlined_call_operand.vmem [shape: f32[4,64,128], index: 0, kind: input, shape index: {}, may-alias: {0,1}]   ;;  %s1364_s1 = inlined_call_operand.vmem [shape: f32[4,64,128], index: 1, kind: input, shape index: {}, may-alias: {0,1}]   ;;  %s1365_s2 = inlined_call_operand.vmem [shape: f32[128,128], index: 2, kind: input, shape index: {}]   ;;  %s1366_s3 = inlined_call_operand.vmem [shape: f32[128,32], index: 3, kind: input, shape index: {}]   ;;  %s1367_s4 = inlined_call_operand.vmem [shape: f32[32,32], index: 4, kind: input, shape index: {}]   ;;  %s1368_s5 = inlined_call_operand.vmem [shape: f32[128,128], index: 5, kind: input, shape index: {}]   ;;  %s1369_s6 = inlined_call_operand.vmem [shape: f32[4,32,6], index: 6, kind: output, shape index: {}]  }
   0x1   :  { %s1139_s23 = smov 0  }
   0x2 LB: > { %s28_s24 = sadd.s32 1, %s1091_s22  ;;  %p921_p0 = scmp.ge.s32.totalorder %s1095_s23, 1  ;;  %s1095_s23 = sphi %s1139_s23, %s16_s23   ;;  %s1091_s22 = sphi %s1137_s22, %s1371_s22   ;;  %s1087_s21 = sphi %s1135_s21, %s1370_s21  }
   0x3   : > { %p30_p1 = scmp.ge.s32.totalorder %s28_s24, 4  ;;  %p256_p2 = scmp.lt.s32.totalorder %s1095_s23, 5 }
   0x5   : > { %s1373_s24 = smov (%p30_p1, %s28_s24), 0  ;;  %p257_p3 = pnand %p921_p0, %p256_p2 }
   0x6   : > { %p304_p4 = scmp.lt.s32.totalorder (!%p257_p3), %s1087_s21, 3  ;;  %s1097_s27 = smov (!%p257_p3), 96  }
   0x7   : > { %260 = sbr.rel (%p257_p3) target bundleno = 820 (0x334), region = 44  ;;  %s1098_s30 = smov (!%p257_p3), 64  }
   0xc   : > { %v455_v0 = vld [vmem:[%s1365_s2 + $0x78] sm:$0xff]  ;;  %v454_v1 = vld [vmem:[%s1365_s2 + $0x70] sm:$0xff]  ;;  %s1375_s21 = smov (!%p304_p4, %s1087_s21), 3  ;;  %v453_v2 = vld [vmem:[%s1365_s2 + $0x68] sm:$0xff]  ;;  %vm355_vm0 = vcmask 1046528   ;;  %vm377_vm1 = vcmask 785408  }
   0xd   : > { %456 = vmatpush.msra.mxu0 %v455_v0  ;;  %s946_s7 = sshll.u32 %s1375_s21, 6  ;;  %v452_v3 = vld [vmem:[%s1365_s2 + $0x60] sm:$0xff]  ;;  %v451_v4 = vld [vmem:[%s1365_s2 + $0x58] sm:$0xff]  ;;  %v450_v14 = vld [vmem:[%s1365_s2 + $0x50] sm:$0xff]  ;;  %vm406_vm2 = vcmask 523264   ;;  %vm435_vm3 = vcmask 261120  }
   0xe   : > { %s311_s12 = scalar_lea.vmem %s1363_s0, %s946_s7  ;;  %s948_s13 = sadd.s32 32, %s946_s7  ;;  %v449_v19 = vld [vmem:[%s1365_s2 + $0x48] sm:$0xff]  ;;  %v448_v21 = vld [vmem:[%s1365_s2 + $0x40] sm:$0xff]  ;;  %v447_v24 = vld [vmem:[%s1365_s2 + $0x38] sm:$0xff] }
   0xf   : > { %457 = vmatpush.msra.mxu0 %v454_v1  ;;  %v333_v5 = vld [vmem:[%s311_s12] sm:$0xff]  ;;  %v334_v6 = vld [vmem:[%s311_s12 + $0x8] sm:$0xff]  ;;  %v335_v7 = vld [vmem:[%s311_s12 + $0x10] sm:$0xff]  ;;  %s322_s18 = scalar_lea.vmem %s1364_s1, %s948_s13  ;;  %s949_s16 = sshll.u32 %s1375_s21, 5 }
  0x10   : > { %v356_v8 = vrot.slane %v333_v5, 1  ;;  %v357_v9 = vrot.slane %v334_v6, 1  ;;  %v336_v10 = vld [vmem:[%s311_s12 + $0x18] sm:$0xff]  ;;  %v337_v11 = vld [vmem:[%s322_s18] sm:$0xff]  ;;  %v359_v12 = vrot.slane %v335_v7, 1  ;;  %v446_v26 = vld [vmem:[%s1365_s2 + $0x30] sm:$0xff]  ;;  %s332_s19 = scalar_lea.vmem %s1369_s6, %s949_s16 }
  0x11   : > { %458 = vmatpush.msra.mxu0 %v453_v2  ;;  %v361_v13 = vrot.slane %v336_v10, 1  ;;  %v363_v18 = vrot.slane %v337_v11, 1  ;;  %v445_v28 = vld [vmem:[%s1365_s2 + $0x28] sm:$0xff]  ;;  %v444_v29 = vld [vmem:[%s1365_s2 + $0x20] sm:$0xff]  ;;  %v443_v30 = vld [vmem:[%s1365_s2 + $0x18] sm:$0xff] }
  0x12   : > { %v358_v15 = vsel %vm355_vm0, %v356_v8, %v357_v9  ;;  %v360_v22 = vsel %vm355_vm0, %v357_v9, %v359_v12  ;;  %v442_v31 = vld [vmem:[%s1365_s2 + $0x10] sm:$0xff]  ;;  %v441_v32 = vld [vmem:[%s1365_s2 + $0x8] sm:$0xff]  ;;  %v440_v33 = vld [vmem:[%s1365_s2] sm:$0xff] }
  0x13   : > { %459 = vmatpush.msra.mxu0 %v452_v3  ;;  %v981_v16 = vpack.i.bf16 %v358_v15, %v333_v5  ;;  %v362_v17 = vsel %vm355_vm0, %v359_v12, %v361_v13  ;;  %v364_v23 = vsel %vm355_vm0, %v361_v13, %v363_v18  ;;  %v986_v25 = vpack.i.bf16 %v360_v22, %v334_v6  ;;  %v536_v51 = vld [vmem:[%s1366_s3 + $0x78] sm:$0xff]  ;;  %v535_v56 = vld [vmem:[%s1366_s3 + $0x70] sm:$0xff]  ;;  %v534_v57 = vld [vmem:[%s1366_s3 + $0x68] sm:$0xff] }
  0x14   : > { %v991_v20 = vpack.i.bf16 %v362_v17, %v335_v7  ;;  %v996_v27 = vpack.i.bf16 %v364_v23, %v336_v10  ;;  %537 = vmatpush.msra.mxu1 %v536_v51  ;;  %v533_v60 = vld [vmem:[%s1366_s3 + $0x60] sm:$0xff]  ;;  %v532_v61 = vld [vmem:[%s1366_s3 + $0x58] sm:$0xff]  ;;  %v531_v0 = vld [vmem:[%s1366_s3 + $0x50] sm:$0xff] }
  0x15   : > { %460 = vmatpush.msra.mxu0 %v451_v4  ;;  %982 = vrot.lane.b32.xlu0 %v981_v16, %s1097_s27  ;;  %v530_v1 = vld [vmem:[%s1366_s3 + $0x48] sm:$0xff]  ;;  %v529_v4 = vld [vmem:[%s1366_s3 + $0x40] sm:$0xff]  ;;  %v527_v8 = vld [vmem:[%s1366_s3 + $0x30] sm:$0xff] }
  0x16   : > { %992 = vrot.lane.b32.xlu1 %v991_v20, %s1097_s27  ;;  %1002 = vrot.lane.b32.xlu2 %v981_v16, %s1098_s30  ;;  %v526_v9 = vld [vmem:[%s1366_s3 + $0x28] sm:$0xff]  ;;  %v525_v12 = vld [vmem:[%s1366_s3 + $0x20] sm:$0xff] }
  0x17   : > { %461 = vmatpush.msra.mxu0 %v450_v14  ;;  %538 = vmatpush.msra.mxu1 %v535_v56  ;;  %v524_v13 = vld [vmem:[%s1366_s3 + $0x18] sm:$0xff]  ;;  %v522_v17 = vld [vmem:[%s1366_s3 + $0x8] sm:$0xff] }
  0x19   : > { %462 = vmatpush.msra.mxu0 %v449_v19  ;;  %539 = vmatpush.msra.mxu1 %v534_v57 }
  0x1b   : > { %463 = vmatpush.msra.mxu0 %v448_v21  ;;  %540 = vmatpush.msra.mxu1 %v533_v60  ;;  %v521_v21 = vld [vmem:[%s1366_s3] sm:$0xff] }
  0x1d   : > { %464 = vmatpush.msra.mxu0 %v447_v24  ;;  %987 = vrot.lane.b32.xlu0 %v986_v25, %s1097_s27 }
  0x1e   : > { %997 = vrot.lane.b32.xlu1 %v996_v27, %s1097_s27  ;;  %1007 = vrot.lane.b32.xlu2 %v986_v25, %s1098_s30  ;;  %s1099_s27 = smov 32  }
  0x1f   : > { %465 = vmatpush.msra.mxu0 %v446_v26  ;;  %541 = vmatpush.msra.mxu1 %v532_v61 }
  0x21   : > { %466 = vmatpush.msra.mxu0 %v445_v28  ;;  %542 = vmatpush.msra.mxu1 %v531_v0 }
  0x23   : > { %467 = vmatpush.msra.mxu0 %v444_v29  ;;  %543 = vmatpush.msra.mxu1 %v530_v1 }
  0x25   : > { %468 = vmatpush.msra.mxu0 %v443_v30  ;;  %1012 = vrot.lane.b32.xlu0 %v991_v20, %s1098_s30 }
  0x26   : > { %1017 = vrot.lane.b32.xlu1 %v996_v27, %s1098_s30  ;;  %1022 = vrot.lane.b32.xlu2 %v981_v16, %s1099_s27  ;;  %v523_v16 = vld [vmem:[%s1366_s3 + $0x10] sm:$0xff] }
  0x27   : > { %469 = vmatpush.msra.mxu0 %v442_v31  ;;  %544 = vmatpush.msra.mxu1 %v529_v4 }
  0x29   : > { %470 = vmatpush.msra.mxu0 %v441_v32 }
  0x2b   : > { %471 = vmatpush.msra.mxu0 %v440_v33 }
  0x2c   : > { %472 = vmatmul.f32.vlgmr.msra.gmra.mxu0 %v333_v5  ;;  %v528_v5 = vld [vmem:[%s1366_s3 + $0x38] sm:$0xff] }
  0x2d   : > { %1027 = vrot.lane.b32.xlu0 %v986_v25, %s1099_s27  ;;  %545 = vmatpush.msra.mxu1 %v528_v5 }
  0x2e   : > { %1032 = vrot.lane.b32.xlu1 %v991_v20, %s1099_s27  ;;  %1037 = vrot.lane.b32.xlu2 %v996_v27, %s1099_s27 }
  0x2f   : > { %546 = vmatpush.msra.mxu1 %v527_v8 }
  0x31   : > { %547 = vmatpush.msra.mxu1 %v526_v9 }
  0x33   : > { %548 = vmatpush.msra.mxu1 %v525_v12 }
  0x34   : > { %475 = vmatmul.f32.gmra.mxu0 %v334_v6 }
  0x35   : > { %549 = vmatpush.msra.mxu1 %v524_v13 }
  0x37   : > { %550 = vmatpush.msra.mxu1 %v523_v16 }
  0x39   : > { %551 = vmatpush.msra.mxu1 %v522_v17 }
  0x3b   : > { %552 = vmatpush.msra.mxu1 %v521_v21 }
  0x3c   : > { %478 = vmatmul.f32.gmra.mxu0 %v335_v7 }
  0x44   : > { %481 = vmatmul.f32.gmra.mxu0 %v336_v10 }
  0x70   : > { %v1003_v49 = vpop.permute.xlu2 %1002 }
  0x71   : > { %v1005_v52 = vunpack.i.h.bf16 %v1003_v49  ;;  %v1004_v53 = vunpack.i.l.bf16 %v1003_v49  ;;  %v618_v49 = vld [vmem:[%s1367_s4] sm:$0xff] }
  0x73   : > { %v407_v54 = vsel %vm406_vm2, %v1004_v53, %v1005_v52 }
  0x78   : > { %v1008_v55 = vpop.permute.xlu2 %1007 }
  0x79   : > { %v1010_v58 = vunpack.i.h.bf16 %v1008_v55  ;;  %v1009_v59 = vunpack.i.l.bf16 %v1008_v55 }
  0x7b   : > { %v408_v62 = vsel %vm406_vm2, %v1009_v59, %v1010_v58 }
  0x80   : > { %v1023_v15 = vpop.permute.xlu2 %1022 }
  0x81   : > { %v1025_v19 = vunpack.i.h.bf16 %v1023_v15  ;;  %v1024_v20 = vunpack.i.l.bf16 %v1023_v15 }
  0x83   : > { %v436_v22 = vsel %vm435_vm3, %v1024_v20, %v1025_v19 }
  0x87   : > { %v983_v34 = vpop.permute.xlu0 %982 }
  0x88   : > { %v985_v35 = vunpack.i.h.bf16 %v983_v34  ;;  %v984_v36 = vunpack.i.l.bf16 %v983_v34  ;;  %v993_v39 = vpop.permute.xlu1 %992  ;;  %v1038_v33 = vpop.permute.xlu2 %1037 }
  0x89   : > { %v995_v43 = vunpack.i.h.bf16 %v993_v39  ;;  %v994_v44 = vunpack.i.l.bf16 %v993_v39  ;;  %v1040_v34 = vunpack.i.h.bf16 %v1038_v33 }
  0x8a   : > { %v378_v37 = vsel %vm377_vm1, %v984_v36, %v985_v35  ;;  %v1039_v35 = vunpack.i.l.bf16 %v1038_v33 }
  0x8b   : > { %484 = vmatmul.f32.gmra.mxu0 %v378_v37  ;;  %v380_v45 = vsel %vm377_vm1, %v994_v44, %v995_v43 }
  0x8c   : > { %v439_v37 = vsel %vm435_vm3, %v1039_v35, %v1040_v34  ;;  %v782_v34 = vld [vmem:[%s1368_s5 + $0x78] sm:$0xff]  ;;  %v781_v35 = vld [vmem:[%s1368_s5 + $0x70] sm:$0xff] }
  0x8d   : > { %783 = vmatpush.msra.mxu3 %v782_v34 }
  0x8f   : > { %v988_v38 = vpop.permute.xlu0 %987  ;;  %784 = vmatpush.msra.mxu3 %v781_v35 }
  0x90   : > { %v990_v40 = vunpack.i.h.bf16 %v988_v38  ;;  %v989_v41 = vunpack.i.l.bf16 %v988_v38  ;;  %v998_v46 = vpop.permute.xlu1 %997 }
  0x91   : > { %v1000_v47 = vunpack.i.h.bf16 %v998_v46  ;;  %v999_v48 = vunpack.i.l.bf16 %v998_v46  ;;  %v621_v46 = vld [vmem:[%s1367_s4 + $0x18] sm:$0xff] }
  0x92   : > { %v379_v42 = vsel %vm377_vm1, %v989_v41, %v990_v40  ;;  %682 = vmatpush.msra.mxu2 %v621_v46  ;;  %v772_v46 = vld [vmem:[%s1368_s5 + $0x28] sm:$0xff] }
  0x93   : > { %487 = vmatmul.f32.gmra.mxu0 %v379_v42  ;;  %v381_v50 = vsel %vm377_vm1, %v999_v48, %v1000_v47  ;;  %v620_v47 = vld [vmem:[%s1367_s4 + $0x10] sm:$0xff]  ;;  %v619_v48 = vld [vmem:[%s1367_s4 + $0x8] sm:$0xff] }
  0x94   : > { %683 = vmatpush.msra.mxu2 %v620_v47  ;;  %v771_v47 = vld [vmem:[%s1368_s5 + $0x20] sm:$0xff] }
  0x96   : > { %684 = vmatpush.msra.mxu2 %v619_v48  ;;  %v770_v48 = vld [vmem:[%s1368_s5 + $0x18] sm:$0xff] }
  0x97   : > { %v1013_v63 = vpop.permute.xlu0 %1012 }
  0x98   : > { %v1015_v2 = vunpack.i.h.bf16 %v1013_v63  ;;  %v1014_v3 = vunpack.i.l.bf16 %v1013_v63  ;;  %v1018_v7 = vpop.permute.xlu1 %1017  ;;  %685 = vmatpush.msra.mxu2 %v618_v49 }
  0x99   : > { %v1020_v10 = vunpack.i.h.bf16 %v1018_v7  ;;  %v1019_v11 = vunpack.i.l.bf16 %v1018_v7 }
  0x9a   : > { %v409_v6 = vsel %vm406_vm2, %v1014_v3, %v1015_v2 }
  0x9b   : > { %490 = vmatmul.f32.gmra.mxu0 %v380_v45  ;;  %v410_v14 = vsel %vm406_vm2, %v1019_v11, %v1020_v10 }
  0x9f   : > { %v1028_v23 = vpop.permute.xlu0 %1027 }
  0xa0   : > { %v1030_v25 = vunpack.i.h.bf16 %v1028_v23  ;;  %v1029_v26 = vunpack.i.l.bf16 %v1028_v23  ;;  %v1033_v28 = vpop.permute.xlu1 %1032 }
  0xa1   : > { %v1035_v29 = vunpack.i.h.bf16 %v1033_v28  ;;  %v1034_v30 = vunpack.i.l.bf16 %v1033_v28 }
  0xa2   : > { %v437_v27 = vsel %vm435_vm3, %v1029_v26, %v1030_v25 }
  0xa3   : > { %493 = vmatmul.f32.gmra.mxu0 %v381_v50  ;;  %v438_v32 = vsel %vm435_vm3, %v1034_v30, %v1035_v29 }
  0xa9   : > { %v473_v18 = vpop.f32.mrf.mxu0 }
  0xaa   : > { %553 = vmatmul.f32.vlgmr.msra.gmra.mxu1 %v473_v18 }
  0xab   : > { %496 = vmatmul.f32.gmra.mxu0 %v407_v54 }
  0xb1   : > { %v476_v24 = vpop.f32.mrf.mxu0 }
  0xb2   : > { %556 = vmatmul.f32.gmra.mxu1 %v476_v24 }
  0xb3   : > { %499 = vmatmul.f32.gmra.mxu0 %v408_v62 }
  0xb9   : > { %v479_v31 = vpop.f32.mrf.mxu0 }
  0xba   : > { %559 = vmatmul.f32.gmra.mxu1 %v479_v31 }
  0xbb   : > { %502 = vmatmul.f32.gmra.mxu0 %v409_v6 }
  0xc1   : > { %v482_v36 = vpop.f32.mrf.mxu0 }
  0xc2   : > { %562 = vmatmul.f32.gmra.mxu1 %v482_v36  ;;  %v780_v36 = vld [vmem:[%s1368_s5 + $0x68] sm:$0xff] }
  0xc3   : > { %505 = vmatmul.f32.gmra.mxu0 %v410_v14  ;;  %785 = vmatpush.msra.mxu3 %v780_v36 }
  0xcb   : > { %508 = vmatmul.f32.gmra.mxu0 %v436_v22 }
  0xd3   : > { %511 = vmatmul.f32.gmra.mxu0 %v437_v27 }
  0xdb   : > { %514 = vmatmul.f32.gmra.mxu0 %v438_v32 }
  0xe3   : > { %517 = vmatmul.f32.gmra.mxu0 %v439_v37  ;;  %v779_v37 = vld [vmem:[%s1368_s5 + $0x60] sm:$0xff] }
  0xe4   : > { %786 = vmatpush.msra.mxu3 %v779_v37 }
 0x108   : > { %v485_v38 = vpop.f32.mrf.mxu0 }
 0x109   : > { %565 = vmatmul.f32.gmra.mxu1 %v485_v38  ;;  %v778_v38 = vld [vmem:[%s1368_s5 + $0x58] sm:$0xff] }
 0x10a   : > { %787 = vmatpush.msra.mxu3 %v778_v38 }
 0x110   : > { %v488_v39 = vpop.f32.mrf.mxu0 }
 0x111   : > { %568 = vmatmul.f32.gmra.mxu1 %v488_v39 }
 0x118   : > { %v491_v40 = vpop.f32.mrf.mxu0 }
 0x119   : > { %571 = vmatmul.f32.gmra.mxu1 %v491_v40  ;;  %v777_v40 = vld [vmem:[%s1368_s5 + $0x50] sm:$0xff] }
 0x11a   : > { %788 = vmatpush.msra.mxu3 %v777_v40 }
 0x120   : > { %v494_v41 = vpop.f32.mrf.mxu0 }
 0x121   : > { %574 = vmatmul.f32.gmra.mxu1 %v494_v41  ;;  %v776_v41 = vld [vmem:[%s1368_s5 + $0x48] sm:$0xff] }
 0x122   : > { %789 = vmatpush.msra.mxu3 %v776_v41 }
 0x127   : > { %v554_v50 = vpop.f32.mrf.mxu1 }
 0x128   : > { %v497_v42 = vpop.f32.mrf.mxu0  ;;  %1041 = vtanh.f32 %v554_v50  ;;  %v769_v50 = vld [vmem:[%s1368_s5 + $0x10] sm:$0xff] }
 0x129   : > { %577 = vmatmul.f32.gmra.mxu1 %v497_v42  ;;  %v775_v42 = vld [vmem:[%s1368_s5 + $0x40] sm:$0xff] }
 0x12a   : > { %790 = vmatpush.msra.mxu3 %v775_v42 }
 0x12e   : > { %v1042_v52 = vpop.eup %1041 }
 0x12f   : > { %v557_v53 = vpop.f32.mrf.mxu1  ;;  %928 = vmatmul.msk.f32.vlgmr.msra.gmra.mxu2 %vm435_vm3, %v1042_v52  ;;  %v767_v52 = vld [vmem:[%s1368_s5] sm:$0xff] }
 0x130   : > { %v500_v43 = vpop.f32.mrf.mxu0  ;;  %1043 = vtanh.f32 %v557_v53 }
 0x131   : > { %580 = vmatmul.f32.gmra.mxu1 %v500_v43  ;;  %v774_v43 = vld [vmem:[%s1368_s5 + $0x38] sm:$0xff] }
 0x132   : > { %791 = vmatpush.msra.mxu3 %v774_v43 }
 0x136   : > { %v1044_v55 = vpop.eup %1043 }
 0x137   : > { %v560_v56 = vpop.f32.mrf.mxu1  ;;  %929 = vmatmul.msk.f32.gmra.mxu2 %vm435_vm3, %v1044_v55 }
 0x138   : > { %v503_v44 = vpop.f32.mrf.mxu0  ;;  %1045 = vtanh.f32 %v560_v56 }
 0x139   : > { %583 = vmatmul.f32.gmra.mxu1 %v503_v44 }
 0x13e   : > { %v1046_v58 = vpop.eup %1045 }
 0x13f   : > { %v563_v59 = vpop.f32.mrf.mxu1  ;;  %930 = vmatmul.msk.f32.gmra.mxu2 %vm435_vm3, %v1046_v58 }
 0x140   : > { %v506_v45 = vpop.f32.mrf.mxu0  ;;  %1047 = vtanh.f32 %v563_v59 }
 0x141   : > { %586 = vmatmul.f32.gmra.mxu1 %v506_v45  ;;  %v773_v45 = vld [vmem:[%s1368_s5 + $0x30] sm:$0xff] }
 0x142   : > { %792 = vmatpush.msra.mxu3 %v773_v45 }
 0x144   : > { %793 = vmatpush.msra.mxu3 %v772_v46 }
 0x146   : > { %v1048_v61 = vpop.eup %1047  ;;  %794 = vmatpush.msra.mxu3 %v771_v47 }
 0x147   : > { %931 = vmatmul.msk.f32.gmra.mxu2 %vm435_vm3, %v1048_v61 }
 0x148   : > { %v509_v51 = vpop.f32.mrf.mxu0  ;;  %795 = vmatpush.msra.mxu3 %v770_v48 }
 0x149   : > { %589 = vmatmul.f32.gmra.mxu1 %v509_v51  ;;  %v768_v51 = vld [vmem:[%s1368_s5 + $0x8] sm:$0xff] }
 0x14a   : > { %796 = vmatpush.msra.mxu3 %v769_v50 }
 0x14c   : > { %797 = vmatpush.msra.mxu3 %v768_v51 }
 0x14e   : > { %798 = vmatpush.msra.mxu3 %v767_v52 }
 0x150   : > { %v512_v54 = vpop.f32.mrf.mxu0 }
 0x151   : > { %592 = vmatmul.f32.gmra.mxu1 %v512_v54 }
 0x158   : > { %v515_v57 = vpop.f32.mrf.mxu0 }
 0x159   : > { %595 = vmatmul.f32.gmra.mxu1 %v515_v57 }
 0x160   : > { %v518_v60 = vpop.f32.mrf.mxu0 }
 0x161   : > { %598 = vmatmul.f32.gmra.mxu1 %v518_v60 }
 0x186   : > { %v566_v62 = vpop.f32.mrf.mxu1 }
 0x187   : > { %1049 = vtanh.f32 %v566_v62 }
 0x18d   : > { %v1050_v63 = vpop.eup %1049 }
 0x18e   : > { %v569_v0 = vpop.f32.mrf.mxu1  ;;  %932 = vmatmul.msk.f32.gmra.mxu2 %vm435_vm3, %v1050_v63 }
 0x18f   : > { %1051 = vtanh.f32 %v569_v0 }
 0x195   : > { %v1052_v1 = vpop.eup %1051 }
 0x196   : > { %v572_v2 = vpop.f32.mrf.mxu1  ;;  %933 = vmatmul.msk.f32.gmra.mxu2 %vm435_vm3, %v1052_v1 }
 0x197   : > { %1053 = vtanh.f32 %v572_v2 }
 0x19d   : > { %v1054_v3 = vpop.eup %1053 }
 0x19e   : > { %v575_v4 = vpop.f32.mrf.mxu1  ;;  %934 = vmatmul.msk.f32.gmra.mxu2 %vm435_vm3, %v1054_v3 }
 0x19f   : > { %1055 = vtanh.f32 %v575_v4 }
 0x1a5   : > { %v1056_v5 = vpop.eup %1055 }
 0x1a6   : > { %v578_v6 = vpop.f32.mrf.mxu1  ;;  %935 = vmatmul.msk.f32.gmra.mxu2 %vm435_vm3, %v1056_v5 }
 0x1a7   : > { %1057 = vtanh.f32 %v578_v6 }
 0x1ad   : > { %v1058_v7 = vpop.eup %1057 }
 0x1ae   : > { %v581_v8 = vpop.f32.mrf.mxu1  ;;  %936 = vmatmul.msk.f32.gmra.mxu2 %vm435_vm3, %v1058_v7 }
 0x1af   : > { %1059 = vtanh.f32 %v581_v8 }
 0x1b2   : > { %v687_v17 = vpop.f32.mrf.mxu2 }
 0x1b3   : > { %735 = vxpose.xlu0.b32.start [1/16] (narrow) %v687_v17, 32 }
 0x1b5   : > { %v1060_v9 = vpop.eup %1059 }
 0x1b6   : > { %v584_v10 = vpop.f32.mrf.mxu1  ;;  %937 = vmatmul.msk.f32.gmra.mxu2 %vm435_vm3, %v1060_v9 }
 0x1b7   : > { %1061 = vtanh.f32 %v584_v10 }
 0x1ba   : > { %v690_v20 = vpop.f32.mrf.mxu2 }
 0x1bb   : > { %736 = vxpose.xlu0.b32.cont [2/16] (narrow) %v690_v20, 32 }
 0x1bd   : > { %v1062_v11 = vpop.eup %1061 }
 0x1be   : > { %v587_v12 = vpop.f32.mrf.mxu1  ;;  %938 = vmatmul.msk.f32.gmra.mxu2 %vm435_vm3, %v1062_v11 }
 0x1bf   : > { %1063 = vtanh.f32 %v587_v12 }
 0x1c2   : > { %v693_v23 = vpop.f32.mrf.mxu2 }
 0x1c3   : > { %737 = vxpose.xlu0.b32.cont [3/16] (narrow) %v693_v23, 32 }
 0x1c5   : > { %v1064_v13 = vpop.eup %1063 }
 0x1c6   : > { %v590_v14 = vpop.f32.mrf.mxu1  ;;  %939 = vmatmul.msk.f32.gmra.mxu2 %vm435_vm3, %v1064_v13 }
 0x1c7   : > { %1065 = vtanh.f32 %v590_v14 }
 0x1ca   : > { %v696_v25 = vpop.f32.mrf.mxu2 }
 0x1cb   : > { %738 = vxpose.xlu0.b32.cont [4/16] (narrow) %v696_v25, 32 }
 0x1cd   : > { %v1066_v15 = vpop.eup %1065 }
 0x1ce   : > { %v593_v16 = vpop.f32.mrf.mxu1  ;;  %940 = vmatmul.msk.f32.gmra.mxu2 %vm435_vm3, %v1066_v15 }
 0x1cf   : > { %1067 = vtanh.f32 %v593_v16 }
 0x1d5   : > { %v1068_v18 = vpop.eup %1067 }
 0x1d6   : > { %v596_v19 = vpop.f32.mrf.mxu1  ;;  %941 = vmatmul.msk.f32.gmra.mxu2 %vm435_vm3, %v1068_v18 }
 0x1d7   : > { %1069 = vtanh.f32 %v596_v19 }
 0x1dd   : > { %v1070_v21 = vpop.eup %1069 }
 0x1de   : > { %v599_v22 = vpop.f32.mrf.mxu1  ;;  %942 = vmatmul.msk.f32.gmra.mxu2 %vm435_vm3, %v1070_v21 }
 0x1df   : > { %1071 = vtanh.f32 %v599_v22 }
 0x1e5   : > { %v1072_v24 = vpop.eup %1071 }
 0x1e6   : > { %943 = vmatmul.msk.f32.gmra.mxu2 %vm435_vm3, %v1072_v24 }
 0x211   : > { %v699_v26 = vpop.f32.mrf.mxu2 }
 0x212   : > { %739 = vxpose.xlu0.b32.cont [5/16] (narrow) %v699_v26, 32 }
 0x219   : > { %v702_v27 = vpop.f32.mrf.mxu2 }
 0x21a   : > { %740 = vxpose.xlu0.b32.cont [6/16] (narrow) %v702_v27, 32 }
 0x221   : > { %v705_v28 = vpop.f32.mrf.mxu2 }
 0x222   : > { %741 = vxpose.xlu0.b32.cont [7/16] (narrow) %v705_v28, 32 }
 0x229   : > { %v708_v29 = vpop.f32.mrf.mxu2 }
 0x22a   : > { %742 = vxpose.xlu0.b32.cont [8/16] (narrow) %v708_v29, 32 }
 0x231   : > { %v711_v30 = vpop.f32.mrf.mxu2 }
 0x232   : > { %743 = vxpose.xlu0.b32.cont [9/16] (narrow) %v711_v30, 32 }
 0x239   : > { %v714_v31 = vpop.f32.mrf.mxu2 }
 0x23a   : > { %744 = vxpose.xlu0.b32.cont [10/16] (narrow) %v714_v31, 32 }
 0x241   : > { %v717_v32 = vpop.f32.mrf.mxu2 }
 0x242   : > { %745 = vxpose.xlu0.b32.cont [11/16] (narrow) %v717_v32, 32 }
 0x249   : > { %v720_v33 = vpop.f32.mrf.mxu2 }
 0x24a   : > { %746 = vxpose.xlu0.b32.cont [12/16] (narrow) %v720_v33, 32 }
 0x251   : > { %v723_v39 = vpop.f32.mrf.mxu2 }
 0x252   : > { %747 = vxpose.xlu0.b32.cont [13/16] (narrow) %v723_v39, 32 }
 0x259   : > { %v726_v44 = vpop.f32.mrf.mxu2 }
 0x25a   : > { %748 = vxpose.xlu0.b32.cont [14/16] (narrow) %v726_v44, 32 }
 0x261   : > { %v729_v49 = vpop.f32.mrf.mxu2 }
 0x262   : > { %749 = vxpose.xlu0.b32.cont [15/16] (narrow) %v729_v49, 32 }
 0x269   : > { %v732_v53 = vpop.f32.mrf.mxu2 }
 0x26a   : > { %750 = vxpose.xlu0.b32.end [16/16] (narrow) %v732_v53, 32 }
 0x296   : > { %v751_v54 = vpop.trf.xlu0 }
 0x297   : > { %799 = vmatmul.f32.vlgmr.msra.gmra.mxu3 %v751_v54 }
 0x29e   : > { %v752_v55 = vpop.trf.xlu0 }
 0x29f   : > { %802 = vmatmul.f32.gmra.mxu3 %v752_v55 }
 0x2a6   : > { %v753_v56 = vpop.trf.xlu0 }
 0x2a7   : > { %805 = vmatmul.f32.gmra.mxu3 %v753_v56 }
 0x2ae   : > { %v754_v57 = vpop.trf.xlu0 }
 0x2af   : > { %808 = vmatmul.f32.gmra.mxu3 %v754_v57 }
 0x31a   : > { %v800_v58 = vpop.f32.mrf.mxu3 }
 0x31b   : > { %812 = vst [vmem:[%s332_s19] sm:$0xff] %v800_v58 }
 0x322   : > { %v803_v59 = vpop.f32.mrf.mxu3 }
 0x323   : > { %813 = vst [vmem:[%s332_s19 + $0x8] sm:$0xff] %v803_v59 }
 0x32a   : > { %v806_v60 = vpop.f32.mrf.mxu3 }
 0x32b   : > { %814 = vst [vmem:[%s332_s19 + $0x10] sm:$0xff] %v806_v60 }
 0x332   : > { %v809_v61 = vpop.f32.mrf.mxu3 }
 0x333   : > { %815 = vst [vmem:[%s332_s19 + $0x18] sm:$0xff] %v809_v61 }
 0x334 PF: > { %s16_s23 = sadd.s32 1, %s1095_s23   ;;  %s1370_s21 = smov %s1091_s22 }
 0x335   : > { %p13_p5 = scmp.ge.s32.totalorder %s16_s23, 6   ;;  %s1371_s22 = smov %s1373_s24 }
 0x337   :  { %15 = sbr.rel (!%p13_p5) target bundleno = 2 (0x2), region = 77 }

</bundles_post_ra>
